<compile_context>
chip_gen: v7x
topology: tpu7x:2x2x1
jax: 0.10.0
libtpu: 0.0.40
codegen_flags: <defaults>
</compile_context>

<pallas_src>
import functools

import numpy as np
import jax
import jax.numpy as jnp
from jax.experimental import pallas as pl
from jax.experimental.pallas import tpu as pltpu

LANES = 128        # node axis maps to TPU lanes
BLOCK_ROWS = 512   # sublane rows per grid step -> 65536 nodes/step (~2.2 MiB VMEM)


def _node_primary_ce_kernel(nvalid_ref, pred_ref, targ_ref, out_ref):
    """Accumulate per-node CE loss and correct-prediction indicators.

    nvalid_ref : (1,) int32 scalar-prefetch (SMEM) -- number of valid nodes
    pred_ref   : (2, R, 128) f32  logits, class-major
    targ_ref   : (R, 128)    int8 target in {0, 1} (padding value irrelevant)
    out_ref    : (2, R, 128) f32  resident accumulator: [0]=loss, [1]=correct
    """
    k = pl.program_id(0)

    @pl.when(k == 0)
    def _():
        out_ref[...] = jnp.zeros_like(out_ref)

    r = targ_ref.shape[0]
    row = jax.lax.broadcasted_iota(jnp.int32, (r, LANES), 0)
    lane = jax.lax.broadcasted_iota(jnp.int32, (r, LANES), 1)
    node_id = (k * r + row) * LANES + lane
    valid = (node_id < nvalid_ref[0]).astype(jnp.float32)

    t = targ_ref[...].astype(jnp.float32) > 0.5   # boolean target
    l0 = pred_ref[0]                              # (R, 128) logits for class 0
    l1 = pred_ref[1]                              # (R, 128) logits for class 1

    # 2-class CE = softplus(l_other - l_target), stable form (1 exp + 1 log).
    z = jnp.where(t, l0 - l1, l1 - l0)
    ce = jnp.maximum(z, 0.0) + jnp.log(1.0 + jnp.exp(-jnp.abs(z)))

    # argmax with torch first-index tie-break: tie -> class 0.
    correct = ((l1 > l0) == t).astype(jnp.float32)

    out_ref[0] += ce * valid
    out_ref[1] += correct * valid


@functools.partial(jax.jit, static_argnums=(2, 3, 4))
def _node_primary_ce_call(pred, targ_i8, n, rows, block_rows):
    npad = rows * LANES
    pred_packed = (jnp.zeros((2, npad), jnp.float32)
                   .at[:, :n].set(pred.T)
                   .reshape(2, rows, LANES))
    targ_packed = (jnp.zeros((npad,), jnp.int8)
                   .at[:n].set(targ_i8)
                   .reshape(rows, LANES))
    nvalid = jnp.array([n], jnp.int32)

    partials = pl.pallas_call(
        _node_primary_ce_kernel,
        out_shape=jax.ShapeDtypeStruct((2, block_rows, LANES), jnp.float32),
        grid_spec=pltpu.PrefetchScalarGridSpec(
            num_scalar_prefetch=1,
            grid=(rows // block_rows,),
            in_specs=[
                pl.BlockSpec((2, block_rows, LANES), lambda k, nref: (0, k, 0)),
                pl.BlockSpec((block_rows, LANES), lambda k, nref: (k, 0)),
            ],
            out_specs=pl.BlockSpec((2, block_rows, LANES),
                                   lambda k, nref: (0, 0, 0)),
        ),
        compiler_params=pltpu.CompilerParams(
            dimension_semantics=("arbitrary",)),
    )(nvalid, pred_packed, targ_packed)

    # Single cross-lane reduction, outside the grid loop.
    return jnp.sum(partials[0]), jnp.sum(partials[1])


def node_primary_ce_sum(node_pred, node_assn, max_block_rows=BLOCK_ROWS):
    """CE(reduction='sum') loss and argmax-correct count for (N, 2) predictions."""
    assert max_block_rows % 32 == 0  # keep int8 blocks on native (32,128) tiles
    n = int(node_pred.shape[0])
    rows = -(-n // LANES)                      # ceil(n / 128)
    rows = max(8, -(-rows // 8) * 8)           # multiple of 8, at least 8
    if rows > max_block_rows:
        rows = -(-rows // max_block_rows) * max_block_rows
        block_rows = max_block_rows
    else:
        block_rows = rows

    pred = jnp.asarray(node_pred, jnp.float32)
    targ = jnp.asarray(node_assn, jnp.int8)
    return _node_primary_ce_call(pred, targ, n, rows, block_rows)


def get_cluster_label(labels, clusts, column=5):
    """Majority label value of `column` over each cluster's voxels (host glue)."""
    labels = np.asarray(labels)
    out = []
    for c in clusts:
        v, cnt = np.unique(labels[np.asarray(c), column], return_counts=True)
        out.append(v[np.argmax(cnt)])
    return np.array(out)


class NodePrimaryLoss:
    def __init__(self, loss_config):
        self.batch_col = loss_config.get('batch_col', 3)
        self.loss = loss_config.get('loss', 'CE')
        self.reduction = loss_config.get('reduction', 'sum')
        self.balance_classes = loss_config.get('balance_classes', False)
        self.high_purity = loss_config.get('high_purity', False)
        self.use_group_pred = loss_config.get('use_group_pred', False)
        if self.loss != 'CE':
            # TODO(synk): MultiMarginLoss ('MM') variant not ported to the kernel.
            raise ValueError('Loss not supported in Pallas port: ' + self.loss)
        if self.balance_classes or self.high_purity or self.use_group_pred:
            # TODO(synk): balance_classes / high_purity / use_group_pred branches
            # (host-side numpy graph relabelling / reweighting) are not ported.
            raise NotImplementedError('Unported NodePrimaryLoss options enabled')

    def forward(self, out, clusters):
        pred_segs, targ_segs, seg_sizes = [], [], []
        n_clusts = 0
        for i in range(len(clusters)):
            if 'node_pred' not in out:
                continue
            labels_all = np.asarray(clusters[i])
            batches = labels_all[:, self.batch_col]
            nbatches = len(np.unique(batches))
            for j in range(nbatches):
                labels = labels_all[batches == j]
                node_pred = np.asarray(out['node_pred'][i][j])
                if not node_pred.shape[0]:
                    continue
                clusts = out['clusts'][i][j]
                clust_ids = get_cluster_label(labels, clusts, column=5)
                group_ids = get_cluster_label(labels, clusts, column=6)
                node_assn = (clust_ids == group_ids).astype(np.int8)
                pred_segs.append(node_pred.astype(np.float32))
                targ_segs.append(node_assn)
                seg_sizes.append(node_pred.shape[0])
                n_clusts += len(clusts)

        if not n_clusts:
            return {'accuracy': 0.0, 'loss': jnp.float32(0.0), 'n_clusts': 0}

        pred_all = np.concatenate(pred_segs, axis=0)
        targ_all = np.concatenate(targ_segs, axis=0)

        if self.reduction == 'sum':
            # Default path: one fused kernel call over all segments.
            total_loss, total_acc = node_primary_ce_sum(pred_all, targ_all)
        else:
            # TODO(synk): per-segment 'mean' normalization is not batched; it
            # falls back to one kernel call per (event, batch) segment.
            total_loss = jnp.float32(0.0)
            total_acc = jnp.float32(0.0)
            off = 0
            for sz in seg_sizes:
                l, a = node_primary_ce_sum(pred_all[off:off + sz],
                                           targ_all[off:off + sz])
                total_loss = total_loss + l / sz
                total_acc = total_acc + a
                off += sz

        return {'accuracy': total_acc / n_clusts,
                'loss': total_loss / n_clusts,
                'n_clusts': n_clusts}


def _ref_ce_sum_and_acc(pred, targ):
    """Plain-JAX reference for validation."""
    logp = jax.nn.log_softmax(pred, axis=1)
    loss = -jnp.sum(logp[jnp.arange(pred.shape[0]), targ])
    acc = jnp.sum((jnp.argmax(pred, axis=1) == targ).astype(jnp.float32))
    return loss, acc


if __name__ == "__main__":
    k0, k1, k2, k3 = jax.random.split(jax.random.PRNGKey(0), 4)

    # --- synthetic clusters: 1 event, 2 batches --------------------------------
    # clusters[0]: (N_vox, 8) columns [x, y, z, batchid, value, id, groupid, shape]
    # batch 0: 6 clusters x 4 voxels, batch 1: 5 clusters x 3 voxels
    b0_groups = [0, 0, 2, 2, 2, 5]     # clusters 0, 2, 5 are primaries
    b1_groups = [1, 1, 1, 4, 4]        # clusters 1, 4 are primaries
    rows = []
    for cid, gid in enumerate(b0_groups):
        for _ in range(4):
            rows.append([0., 0., 0., 0., 1., float(cid), float(gid), 0.])
    for cid, gid in enumerate(b1_groups):
        for _ in range(3):
            rows.append([0., 0., 0., 1., 1., float(cid), float(gid), 0.])
    labels_np = np.array(rows, dtype=np.float32)
    clusters = [jnp.asarray(labels_np)]

    # cluster voxel indices (into each per-batch-filtered label tensor)
    clusts_b0 = [np.arange(c * 4, (c + 1) * 4) for c in range(6)]
    clusts_b1 = [np.arange(c * 3, (c + 1) * 3) for c in range(5)]

    node_pred_b0 = jax.random.normal(k0, (6, 2), dtype=jnp.float32)
    node_pred_b1 = jax.random.normal(k1, (5, 2), dtype=jnp.float32)

    out = {
        'node_pred': [[node_pred_b0, node_pred_b1]],
        'clusts': [[clusts_b0, clusts_b1]],
    }

    model = NodePrimaryLoss({})
    result = model.forward(out, clusters)
    jax.block_until_ready(result['loss'])
    jax.block_until_ready(result['accuracy'])

    # --- validate against a plain-JAX reference --------------------------------
    targ_b0 = jnp.asarray((np.arange(6) == np.array(b0_groups)).astype(np.int32))
    targ_b1 = jnp.asarray((np.arange(5) == np.array(b1_groups)).astype(np.int32))
    l0, a0 = _ref_ce_sum_and_acc(node_pred_b0, targ_b0)
    l1, a1 = _ref_ce_sum_and_acc(node_pred_b1, targ_b1)
    ref_loss = (l0 + l1) / 11.0
    ref_acc = (a0 + a1) / 11.0

    assert result['n_clusts'] == 11
    assert np.allclose(np.asarray(result['loss']), np.asarray(ref_loss),
                       rtol=1e-5, atol=1e-5), (result['loss'], ref_loss)
    assert np.allclose(np.asarray(result['accuracy']), np.asarray(ref_acc),
                       rtol=1e-5, atol=1e-5), (result['accuracy'], ref_acc)

    # --- second check: multi-grid-step accumulation path (grid > 1) ------------
    n_big = 5000
    big_pred = jax.random.normal(k2, (n_big, 2), dtype=jnp.float32)
    big_targ = (jax.random.uniform(k3, (n_big,)) > 0.5).astype(jnp.int32)
    bl, ba = node_primary_ce_sum(big_pred, big_targ, max_block_rows=32)
    jax.block_until_ready(bl)
    rl, ra = _ref_ce_sum_and_acc(big_pred, big_targ)
    assert np.allclose(np.asarray(bl), np.asarray(rl), rtol=1e-4, atol=1e-2), (bl, rl)
    assert np.allclose(np.asarray(ba), np.asarray(ra), atol=0.5), (ba, ra)

    print("KERNEL_OK")
</pallas_src>

<mosaic_0001>
module attributes {stable_mosaic.version = 11 : i64} {
  func.func @_node_primary_ce_kernel(%arg0: i32, %arg1: memref<1xi32, #tpu.memory_space<smem>>, %arg2: memref<2x8x128xf32, #tpu.memory_space<vmem>>, %arg3: memref<8x128xi8, #tpu.memory_space<vmem>>, %arg4: memref<2x8x128xf32, #tpu.memory_space<vmem>>) attributes {dimension_semantics = [#tpu.dimension_semantics<arbitrary>], iteration_bounds = array<i64: 1>, scalar_prefetch = 1 : i64, scratch_operands = 0 : i64, tpu.core_type = #tpu.core_type<tc>, window_params = [{transform_indices = @transform_0, window_bounds = array<i64: 2, 8, 128>}, {transform_indices = @transform_1, window_bounds = array<i64: 8, 128>}, {pipeline_mode = #tpu.pipeline_mode<synchronous>, transform_indices = @transform_2, window_bounds = array<i64: 2, 8, 128>}]} {
    %c0_i32 = arith.constant 0 : i32
    %0 = arith.cmpi eq, %arg0, %c0_i32 : i32
    %1 = arith.extui %0 : i1 to i32
    %c0_i32_0 = arith.constant 0 : i32
    %2 = arith.cmpi ne, %1, %c0_i32_0 : i32
    scf.if %2 {
      %cst_24 = arith.constant 0.000000e+00 : f32
      %56 = vector.broadcast %cst_24 : f32 to vector<2x8x128xf32>
      %c0_25 = arith.constant 0 : index
      %c0_26 = arith.constant 0 : index
      %c0_27 = arith.constant 0 : index
      %57 = vector.load %arg4[%c0_25, %c0_26, %c0_27] : memref<2x8x128xf32, #tpu.memory_space<vmem>>, vector<2x8x128xf32>
      tpu.vector_store %arg4[%c0_25, %c0_26, %c0_27], %56 {strides = array<i32>} : memref<2x8x128xf32, #tpu.memory_space<vmem>>, vector<2x8x128xf32>,
    } else {
    }
    %3 = tpu.iota {dimensions = array<i32: 0>} : vector<8x128xi32>
    %4 = tpu.iota {dimensions = array<i32: 1>} : vector<8x128xi32>
    %c8_i32 = arith.constant 8 : i32
    %5 = arith.muli %arg0, %c8_i32 : i32
    %6 = vector.broadcast %5 : i32 to vector<8x128xi32>
    %7 = arith.addi %6, %3 : vector<8x128xi32>
    %c128_i32 = arith.constant 128 : i32
    %8 = vector.broadcast %c128_i32 : i32 to vector<8x128xi32>
    %9 = arith.muli %7, %8 : vector<8x128xi32>
    %10 = arith.addi %9, %4 : vector<8x128xi32>
    %c0 = arith.constant 0 : index
    %11 = memref.load %arg1[%c0] : memref<1xi32, #tpu.memory_space<smem>>
    %12 = vector.broadcast %11 : i32 to vector<8x128xi32>
    %13 = arith.cmpi slt, %10, %12 : vector<8x128xi32>
    %14 = arith.extui %13 : vector<8x128xi1> to vector<8x128xi32>
    %15 = arith.sitofp %14 : vector<8x128xi32> to vector<8x128xf32>
    %c0_1 = arith.constant 0 : index
    %c0_2 = arith.constant 0 : index
    %16 = vector.load %arg3[%c0_1, %c0_2] : memref<8x128xi8, #tpu.memory_space<vmem>>, vector<8x128xi8>
    %17 = arith.sitofp %16 : vector<8x128xi8> to vector<8x128xf32>
    %cst = arith.constant 5.000000e-01 : f32
    %18 = vector.broadcast %cst : f32 to vector<8x128xf32>
    %19 = arith.cmpf ogt, %17, %18 : vector<8x128xf32>
    %c0_3 = arith.constant 0 : index
    %c0_4 = arith.constant 0 : index
    %c0_5 = arith.constant 0 : index
    %20 = vector.load %arg2[%c0_3, %c0_4, %c0_5] : memref<2x8x128xf32, #tpu.memory_space<vmem>>, vector<1x8x128xf32>
    %21 = vector.shape_cast %20 : vector<1x8x128xf32> to vector<8x128xf32>
    %c1 = arith.constant 1 : index
    %c0_6 = arith.constant 0 : index
    %c0_7 = arith.constant 0 : index
    %22 = vector.load %arg2[%c1, %c0_6, %c0_7] : memref<2x8x128xf32, #tpu.memory_space<vmem>>, vector<1x8x128xf32>
    %23 = vector.shape_cast %22 : vector<1x8x128xf32> to vector<8x128xf32>
    %24 = arith.subf %21, %23 : vector<8x128xf32>
    %25 = arith.subf %23, %21 : vector<8x128xf32>
    %26 = arith.select %19, %24, %25 : vector<8x128xi1>, vector<8x128xf32>
    %cst_8 = arith.constant 0.000000e+00 : f32
    %27 = vector.broadcast %cst_8 : f32 to vector<8x128xf32>
    %28 = arith.maximumf %26, %27 : vector<8x128xf32>
    %29 = math.absf %26 : vector<8x128xf32>
    %cst_9 = arith.constant 0.000000e+00 : f32
    %30 = vector.broadcast %cst_9 : f32 to vector<8x128xf32>
    %31 = arith.subf %30, %29 : vector<8x128xf32>
    %32 = math.exp %31 : vector<8x128xf32>
    %cst_10 = arith.constant 1.000000e+00 : f32
    %33 = vector.broadcast %cst_10 : f32 to vector<8x128xf32>
    %34 = arith.addf %33, %32 : vector<8x128xf32>
    %35 = math.log %34 : vector<8x128xf32>
    %36 = arith.addf %28, %35 : vector<8x128xf32>
    %37 = arith.cmpf ogt, %23, %21 : vector<8x128xf32>
    %38 = arith.xori %37, %19 : vector<8x128xi1>
    %cst_11 = arith.constant dense<true> : vector<8x128xi1>
    %39 = arith.xori %38, %cst_11 : vector<8x128xi1>
    %40 = arith.extui %39 : vector<8x128xi1> to vector<8x128xi32>
    %41 = arith.sitofp %40 : vector<8x128xi32> to vector<8x128xf32>
    %c0_12 = arith.constant 0 : index
    %c0_13 = arith.constant 0 : index
    %c0_14 = arith.constant 0 : index
    %42 = vector.load %arg4[%c0_12, %c0_13, %c0_14] : memref<2x8x128xf32, #tpu.memory_space<vmem>>, vector<1x8x128xf32>
    %43 = vector.shape_cast %42 : vector<1x8x128xf32> to vector<8x128xf32>
    %44 = arith.mulf %36, %15 : vector<8x128xf32>
    %45 = arith.addf %43, %44 : vector<8x128xf32>
    %c0_15 = arith.constant 0 : index
    %c0_16 = arith.constant 0 : index
    %c0_17 = arith.constant 0 : index
    %46 = vector.load %arg4[%c0_15, %c0_16, %c0_17] : memref<2x8x128xf32, #tpu.memory_space<vmem>>, vector<1x8x128xf32>
    %47 = vector.shape_cast %46 : vector<1x8x128xf32> to vector<8x128xf32>
    %48 = vector.shape_cast %45 : vector<8x128xf32> to vector<1x8x128xf32>
    tpu.vector_store %arg4[%c0_15, %c0_16, %c0_17], %48 {strides = array<i32>} : memref<2x8x128xf32, #tpu.memory_space<vmem>>, vector<1x8x128xf32>,
    %c1_18 = arith.constant 1 : index
    %c0_19 = arith.constant 0 : index
    %c0_20 = arith.constant 0 : index
    %49 = vector.load %arg4[%c1_18, %c0_19, %c0_20] : memref<2x8x128xf32, #tpu.memory_space<vmem>>, vector<1x8x128xf32>
    %50 = vector.shape_cast %49 : vector<1x8x128xf32> to vector<8x128xf32>
    %51 = arith.mulf %41, %15 : vector<8x128xf32>
    %52 = arith.addf %50, %51 : vector<8x128xf32>
    %c1_21 = arith.constant 1 : index
    %c0_22 = arith.constant 0 : index
    %c0_23 = arith.constant 0 : index
    %53 = vector.load %arg4[%c1_21, %c0_22, %c0_23] : memref<2x8x128xf32, #tpu.memory_space<vmem>>, vector<1x8x128xf32>
    %54 = vector.shape_cast %53 : vector<1x8x128xf32> to vector<8x128xf32>
    %55 = vector.shape_cast %52 : vector<8x128xf32> to vector<1x8x128xf32>
    tpu.vector_store %arg4[%c1_21, %c0_22, %c0_23], %55 {strides = array<i32>} : memref<2x8x128xf32, #tpu.memory_space<vmem>>, vector<1x8x128xf32>,
    return
  }
  func.func @transform_0(%arg0: i32, %arg1: memref<1xi32, #tpu.memory_space<smem>>) -> (i32, i32, i32) {
    %c0_i32 = arith.constant 0 : i32
    %c0_i32_0 = arith.constant 0 : i32
    %c0_i32_1 = arith.constant 0 : i32
    return %c0_i32, %arg0, %c0_i32_0 : i32, i32, i32
  }
  func.func @transform_1(%arg0: i32, %arg1: memref<1xi32, #tpu.memory_space<smem>>) -> (i32, i32) {
    %c0_i32 = arith.constant 0 : i32
    %c0_i32_0 = arith.constant 0 : i32
    return %arg0, %c0_i32 : i32, i32
  }
  func.func @transform_2(%arg0: i32, %arg1: memref<1xi32, #tpu.memory_space<smem>>) -> (i32, i32, i32) {
    %c0_i32 = arith.constant 0 : i32
    %c0_i32_0 = arith.constant 0 : i32
    %c0_i32_1 = arith.constant 0 : i32
    %c0_i32_2 = arith.constant 0 : i32
    return %c0_i32, %c0_i32_0, %c0_i32_1 : i32, i32, i32
  }
}

</mosaic_0001>

<bundles_post_ra>
// kernel: _node_primary_ce_call.1
= control target key start
LH: loop header
LB: loop body
LE: loop exit
PB: predicated region body
PF: predicated region fallthrough
CT: control target
= control target key end

     0   :  { %v19_v0 = vlaneseq  ;;  %vm81_vm4 = vmmov 1   ;;  %v82_v15 = vmov 0.0   ;;  %s121_s1 = inlined_call_operand.vmem [shape: f32[2,8,128], index: 1, kind: input, shape index: {}]   ;;  %s122_s2 = inlined_call_operand.vmem [shape: s8[8,128], index: 2, kind: input, shape index: {}]   ;;  %s123_s0 = inlined_call_operand.<no memory space> [shape: s32[1], index: 0, kind: input, shape index: {}]   ;;  %s124_s3 = inlined_call_operand.vmem [shape: f32[2,8,128], index: 3, kind: output, shape index: {}]  }
   0x1   :  { %v33_v1 = vld [vmem:[%s122_s2] sm:$0x3]  ;;  %v71_v3 = vld [vmem:[%s121_s1 + $0x8] sm:$0xff]  ;;  %v29_v11 = vstv %s123_s0 }
   0x2   :  { %v37_v2 = vld [vmem:[%s121_s1] sm:$0xff]  ;;  %v20_v4 = vshrl.u32 %v19_v0, 7  ;;  %v22_v5 = vand.u32 127, %v19_v0  ;;  %v34_v6 = vunpack.c.0.s8 %v33_v1 }
   0x3   :  { %v40_v7 = vsub.f32 %v37_v2, %v71_v3  ;;  %v41_v8 = vsub.f32 %v71_v3, %v37_v2  ;;  %vm52_vm0 = vcmp.gt.f32.partialorder %v71_v3, %v37_v2 }
   0x4   :  { %v26_v9 = vmul.u32 128, %v20_v4  ;;  %v35_v10 = vcvt.s32.f32 %v34_v6 }
   0x6   :  { %v27_v12 = vadd.s32 %v26_v9, %v22_v5  ;;  %vm36_vm1 = vcmp.gt.f32.partialorder %v35_v10, 0.5 }
   0x7   :  { %v42_v13 = vsel %vm36_vm1, %v40_v7, %v41_v8  ;;  %vm53_vm2 = vmxor %vm52_vm0, %vm36_vm1 }
   0x8   :  { %vm30_vm3 = vcmp.lt.s32.totalorder %v27_v12, %v29_v11  ;;  %v44_v14 = vand.u32 2147483647, %v42_v13  ;;  %vm54_vm5 = vmxor %vm53_vm2, %vm81_vm4  ;;  %v43_v23 = vmax.f32 %v42_v13, 0.0 }
   0x9   :  { %v70_v16 = vsel %vm30_vm3, 1.0, %v82_v15  ;;  %v72_v17 = vsel %vm54_vm5, 1.0, %v82_v15 }
   0xa   :  { %v45_v18 = vsub.f32 0.0, %v44_v14  ;;  %v63_v19 = vmul.f32 %v72_v17, %v70_v16 }
   0xc   :  { %v46_v20 = vmul.f32 1.442695, %v45_v18  ;;  %74 = vst [vmem:[%s124_s3 + $0x8] sm:$0xff] %v63_v19 }
   0xe   :  { %77 = vpow2.f32 %v46_v20 }
  0x18   :  { %v78_v21 = vpop.eup %77 }
  0x19   :  { %v48_v22 = vadd.f32 1.0, %v78_v21 }
  0x1b   :  { %79 = vlog2.f32 %v48_v22 }
  0x25   :  { %v80_v24 = vpop.eup %79 }
  0x26   :  { %v50_v25 = vmul.f32 0.6931472, %v80_v24 }
  0x28   :  { %v51_v26 = vadd.f32 %v50_v25, %v43_v23 }
  0x2a   :  { %v58_v27 = vmul.f32 %v70_v16, %v51_v26 }
  0x2c   :  { %60 = vst [vmem:[%s124_s3] sm:$0xff] %v58_v27 }

</bundles_post_ra>
